<compile_context>
chip_gen: v6e
topology: v6e:2x2x1
jax: 0.10.0
libtpu: 0.0.40
codegen_flags: <defaults>
</compile_context>

<pallas_src>
from functools import lru_cache

import numpy as np
import jax
import jax.numpy as jnp
from jax.experimental import pallas as pl
from jax.experimental.pallas import tpu as pltpu


# ----------------------------------------------------------------------------
# Host-side topology computation (identical logic to the PyTorch staticmethod).
# ----------------------------------------------------------------------------
@lru_cache(maxsize=256)
def calculate_faces(faces, vn):
    edges = {}
    new_faces = []

    def get_edge_id(e):
        if e not in edges:
            edges[e] = len(edges)
        return edges[e]

    for f in faces:
        a, b, c = (f[0], f[1], f[2])
        e1, e2, e3 = (tuple(sorted([a, b])), tuple(sorted([b, c])),
                      tuple(sorted([c, a])))
        x = get_edge_id(e1) + vn
        y = get_edge_id(e2) + vn
        z = get_edge_id(e3) + vn
        new_faces.append(np.array([x, y, z]))
        new_faces.append(np.array([a, x, z]))
        new_faces.append(np.array([b, y, x]))
        new_faces.append(np.array([c, z, y]))
    new_faces = np.vstack(new_faces)
    new_vertices_idx = np.vstack([np.array(list(k)) for k in edges.keys()])
    return new_vertices_idx, new_faces


def _round_up(x, m):
    return ((x + m - 1) // m) * m


def _choose_tile_e(E, V):
    """Edge-tile width: multiple of 128 lanes, (V, tE) f32 scratch <= ~8 MiB.

    8 MiB keeps the selection tile (plus double-buffered idx/out blocks)
    comfortably under the default scoped-VMEM limit on every generation,
    including v7x's 64 MiB physical / 32 MiB default budget.
    """
    budget_bytes = 8 * 1024 * 1024
    max_te = max(128, (budget_bytes // max(V, 1) // 4) // 128 * 128)
    te = min(512, max_te)               # >=512 lanes amortizes per-step cost
    te = min(te, _round_up(E, 128))     # don't tile past the (padded) data
    return te


# ----------------------------------------------------------------------------
# Pallas kernel: lane-dense edge-midpoint gather+mean via one-hot matmul.
# ----------------------------------------------------------------------------
def _edge_midpoint_kernel(idx_ref, v_ref, o_ref):
    # idx_ref: (1, 2, tE) int32   -- edge endpoint vertex indices (lane-dense)
    # v_ref:   (1, 3, V)  float32 -- vertices of this batch element (lane-dense)
    # o_ref:   (1, 3, tE) float32 -- midpoints of this edge tile (lane-dense)
    idx = idx_ref[0]                                   # (2, tE)
    v_half = v_ref[0].astype(jnp.float32) * 0.5        # (3, V), fold the mean's 0.5
    V = v_half.shape[1]
    tE = idx.shape[1]

    # One-hot selection: sel[v, e] = 1 iff v is one of edge e's endpoints.
    # Single compare/compare/OR/cast pass; endpoints of a valid mesh edge are
    # distinct so OR == sum of the two one-hots.
    row = jax.lax.broadcasted_iota(jnp.int32, (V, tE), 0)
    hit = (row == idx[0:1, :]) | (row == idx[1:2, :])  # sublane-broadcast of idx rows
    sel = hit.astype(jnp.float32)                      # (V, tE)

    # midpoints = 0.5 * (v[i0] + v[i1])  ==  (0.5*v)(3,V) @ sel(V,tE)
    o_ref[0] = jnp.dot(v_half, sel,
                       preferred_element_type=jnp.float32).astype(o_ref.dtype)


def upsample_layer(vertices, faces_np):
    """vertices: jnp (B, V, 3) float32; faces_np: np (B, F, 3) int array."""
    B, V, _ = vertices.shape

    # ---- host-side topology (same as the PyTorch forward loop) ----
    new_idx_list, new_faces_list = [], []
    for b in range(B):
        tuple_faces = tuple(tuple(int(x) for x in f) for f in faces_np[b])
        nvi, nf = calculate_faces(tuple_faces, V)
        new_idx_list.append(nvi)
        new_faces_list.append(nf)
    E = new_idx_list[0].shape[0]
    if any(x.shape[0] != E for x in new_idx_list):
        raise ValueError("All batch elements must yield the same edge count E "
                         "(pad per-batch topologies before calling).")
    new_idx = np.stack(new_idx_list, axis=0).astype(np.int32)      # (B, E, 2)
    new_faces = jnp.asarray(np.stack(new_faces_list, axis=0), jnp.int32)  # (B,4F,3)

    # ---- lane-dense, edge-tiled layout for the kernel ----
    tE = _choose_tile_e(E, V)
    E_pad = _round_up(E, tE)
    idx_t = np.zeros((B, 2, E_pad), dtype=np.int32)                # padded edges -> vertex 0
    idx_t[:, :, :E] = np.transpose(new_idx, (0, 2, 1))
    idx_t = jnp.asarray(idx_t)
    v_t = jnp.transpose(vertices, (0, 2, 1)).astype(jnp.float32)   # (B, 3, V)

    grid = (B, E_pad // tE)
    mids_t = pl.pallas_call(
        _edge_midpoint_kernel,
        out_shape=jax.ShapeDtypeStruct((B, 3, E_pad), jnp.float32),
        grid=grid,
        in_specs=[
            pl.BlockSpec((1, 2, tE), lambda b, e: (b, 0, e)),
            pl.BlockSpec((1, 3, V), lambda b, e: (b, 0, 0)),
        ],
        out_specs=pl.BlockSpec((1, 3, tE), lambda b, e: (b, 0, e)),
        compiler_params=pltpu.CompilerParams(
            dimension_semantics=("parallel", "parallel")),
    )(idx_t, v_t)

    # ---- wrapper-side layout plumbing + concat (tiny: O((V+E)*3)) ----
    mids = jnp.transpose(mids_t[:, :, :E], (0, 2, 1)).astype(vertices.dtype)
    new_verts = jnp.concatenate([vertices, mids], axis=1)          # (B, V+E, 3)
    return new_verts, new_faces


# ----------------------------------------------------------------------------
# Pure-NumPy reference for validation (mirrors torch.gather + mean + cat).
# ----------------------------------------------------------------------------
def upsample_reference(vertices, faces_np):
    B, V, _ = vertices.shape
    new_idx_list, new_faces_list = [], []
    for b in range(B):
        tuple_faces = tuple(tuple(int(x) for x in f) for f in faces_np[b])
        nvi, nf = calculate_faces(tuple_faces, V)
        new_idx_list.append(np.expand_dims(nvi, 0))
        new_faces_list.append(np.expand_dims(nf, 0))
    new_idx = np.vstack(new_idx_list)
    new_faces = np.vstack(new_faces_list)
    verts_np = np.asarray(vertices)
    gathered = np.stack(
        [verts_np[b][new_idx[b]] for b in range(B)], axis=0)   # (B, E, 2, 3)
    mids = gathered.mean(axis=-2)
    new_verts = np.concatenate([verts_np, mids], axis=1)
    return new_verts, new_faces


def make_grid_faces(n):
    """Triangulated (n x n) vertex grid -> faces (2*(n-1)^2, 3)."""
    faces = []
    for r in range(n - 1):
        for c in range(n - 1):
            v00 = r * n + c
            v01 = r * n + c + 1
            v10 = (r + 1) * n + c
            v11 = (r + 1) * n + c + 1
            faces.append([v00, v01, v10])
            faces.append([v01, v11, v10])
    return np.asarray(faces, dtype=np.int64)


if __name__ == "__main__":
    key = jax.random.PRNGKey(0)
    B, n = 2, 4
    V = n * n                                  # 16 vertices
    faces_single = make_grid_faces(n)          # (18, 3)
    faces_np = np.broadcast_to(faces_single, (B,) + faces_single.shape).copy()

    vertices = jax.random.normal(key, (B, V, 3), dtype=jnp.float32)

    new_verts, new_faces = upsample_layer(vertices, faces_np)
    new_verts = jax.block_until_ready(new_verts)
    new_faces = jax.block_until_ready(new_faces)

    ref_verts, ref_faces = upsample_reference(vertices, faces_np)
    assert new_verts.shape == ref_verts.shape
    assert np.array_equal(np.asarray(new_faces), ref_faces)
    np.testing.assert_allclose(np.asarray(new_verts), ref_verts,
                               rtol=1e-5, atol=1e-5)
    print("KERNEL_OK")
</pallas_src>

<mosaic_0001>
module attributes {stable_mosaic.version = 11 : i64} {
  func.func @_edge_midpoint_kernel(%arg0: i32, %arg1: i32, %arg2: memref<1x2x128xi32, #tpu.memory_space<vmem>>, %arg3: memref<1x3x16xf32, #tpu.memory_space<vmem>>, %arg4: memref<1x3x128xf32, #tpu.memory_space<vmem>>) attributes {dimension_semantics = [#tpu.dimension_semantics<parallel>, #tpu.dimension_semantics<parallel>], iteration_bounds = array<i64: 2, 1>, scalar_prefetch = 0 : i64, scratch_operands = 0 : i64, tpu.core_type = #tpu.core_type<tc>, window_params = [{transform_indices = @transform_0, window_bounds = array<i64: 1, 2, 128>}, {transform_indices = @transform_1, window_bounds = array<i64: 1, 3, 16>}, {transform_indices = @transform_2, window_bounds = array<i64: 1, 3, 128>}]} {
    %c0 = arith.constant 0 : index
    %c0_0 = arith.constant 0 : index
    %c0_1 = arith.constant 0 : index
    %0 = vector.load %arg2[%c0, %c0_0, %c0_1] : memref<1x2x128xi32, #tpu.memory_space<vmem>>, vector<1x2x128xi32>
    %1 = vector.shape_cast %0 : vector<1x2x128xi32> to vector<2x128xi32>
    %c0_2 = arith.constant 0 : index
    %c0_3 = arith.constant 0 : index
    %c0_4 = arith.constant 0 : index
    %2 = vector.load %arg3[%c0_2, %c0_3, %c0_4] : memref<1x3x16xf32, #tpu.memory_space<vmem>>, vector<1x3x16xf32>
    %3 = vector.shape_cast %2 : vector<1x3x16xf32> to vector<3x16xf32>
    %cst = arith.constant 5.000000e-01 : f32
    %4 = vector.broadcast %cst : f32 to vector<3x16xf32>
    %5 = arith.mulf %3, %4 : vector<3x16xf32>
    %6 = tpu.iota {dimensions = array<i32: 0>} : vector<16x128xi32>
    %7 = vector.extract_strided_slice %1 {offsets = [0, 0], sizes = [1, 128], strides = [1, 1]} : vector<2x128xi32> to vector<1x128xi32>
    %8 = vector.broadcast %7 : vector<1x128xi32> to vector<16x128xi32>
    %9 = arith.cmpi eq, %6, %8 : vector<16x128xi32>
    %10 = vector.extract_strided_slice %1 {offsets = [1, 0], sizes = [1, 128], strides = [1, 1]} : vector<2x128xi32> to vector<1x128xi32>
    %11 = vector.broadcast %10 : vector<1x128xi32> to vector<16x128xi32>
    %12 = arith.cmpi eq, %6, %11 : vector<16x128xi32>
    %13 = arith.ori %9, %12 : vector<16x128xi1>
    %14 = arith.extui %13 : vector<16x128xi1> to vector<16x128xi32>
    %15 = arith.sitofp %14 : vector<16x128xi32> to vector<16x128xf32>
    %cst_5 = arith.constant dense<0.000000e+00> : vector<3x128xf32>
    %16 = tpu.matmul %5, %15, %cst_5 {dimension_numbers = #tpu.dot_dimension_numbers<[1], [0], [0], [1], [0, 0, 1, 1], [], []>} : vector<3x16xf32>, vector<16x128xf32>, vector<3x128xf32> -> vector<3x128xf32>
    %c0_6 = arith.constant 0 : index
    %c0_7 = arith.constant 0 : index
    %c0_8 = arith.constant 0 : index
    %17 = vector.load %arg4[%c0_6, %c0_7, %c0_8] : memref<1x3x128xf32, #tpu.memory_space<vmem>>, vector<1x3x128xf32>
    %18 = vector.shape_cast %17 : vector<1x3x128xf32> to vector<3x128xf32>
    %19 = vector.shape_cast %16 : vector<3x128xf32> to vector<1x3x128xf32>
    tpu.vector_store %arg4[%c0_6, %c0_7, %c0_8], %19 {strides = array<i32>} : memref<1x3x128xf32, #tpu.memory_space<vmem>>, vector<1x3x128xf32>,
    return
  }
  func.func @transform_0(%arg0: i32, %arg1: i32) -> (i32, i32, i32) {
    %c0_i32 = arith.constant 0 : i32
    %c0_i32_0 = arith.constant 0 : i32
    return %arg0, %c0_i32, %arg1 : i32, i32, i32
  }
  func.func @transform_1(%arg0: i32, %arg1: i32) -> (i32, i32, i32) {
    %c0_i32 = arith.constant 0 : i32
    %c0_i32_0 = arith.constant 0 : i32
    %c0_i32_1 = arith.constant 0 : i32
    return %arg0, %c0_i32, %c0_i32_0 : i32, i32, i32
  }
  func.func @transform_2(%arg0: i32, %arg1: i32) -> (i32, i32, i32) {
    %c0_i32 = arith.constant 0 : i32
    %c0_i32_0 = arith.constant 0 : i32
    return %arg0, %c0_i32, %arg1 : i32, i32, i32
  }
}

</mosaic_0001>

<bundles_post_ra>
// kernel: tpu_custom_call.1
= control target key start
LH: loop header
LB: loop body
LE: loop exit
PB: predicated region body
PF: predicated region fallthrough
CT: control target
= control target key end

     0   :  { %s466_s9 = smov 0   ;;  %s468_s10 = smov 0   ;;  %s502_s0 = inlined_call_operand.vmem [shape: s32[2,2,128], index: 0, kind: input, shape index: {}]   ;;  %s503_s1 = inlined_call_operand.vmem [shape: f32[2,3,16], index: 1, kind: input, shape index: {}]   ;;  %s504_s2 = inlined_call_operand.vmem [shape: f32[2,3,128], index: 2, kind: output, shape index: {}]  }
   0x1   :  { %s470_s11 = smov 0  }
   0x2 LB: > { %s24_s12 = sadd.s32 1, %s442_s10  ;;  %p376_p0 = scmp.ge.s32.totalorder %s446_s11, 1  ;;  %s446_s11 = sphi %s470_s11, %s12_s11   ;;  %s442_s10 = sphi %s468_s10, %s506_s10   ;;  %s438_s9 = sphi %s466_s9, %s505_s9  }
   0x3   : > { %p26_p1 = scmp.ge.s32.totalorder %s24_s12, 2  ;;  %p139_p2 = scmp.lt.s32.totalorder %s446_s11, 3 }
   0x5   : > { %s508_s12 = smov (%p26_p1, %s24_s12), 0  ;;  %p140_p3 = pnand %p376_p0, %p139_p2 }
   0x6   : > { %p169_p4 = scmp.lt.s32.totalorder (!%p140_p3), %s438_s9, 1 }
   0x7   : > { %143 = sbr.rel (%p140_p3) target bundleno = 220 (0xdc), region = 28 }
   0xc   : > { %v190_v0 = vlaneseq  ;;  %v448_v1 = vmov 0.0   ;;  %vm449_vm0 = vmmov 0   ;;  %s510_s9 = smov (!%p169_p4, %s438_s9), 1  ;;  %v450_v11 = vmov 1.0  }
   0xd   : > { %390 = vmatprep.subr.mxu0 %v448_v1  ;;  %394 = vmatprep.mubr.msk.f32.mxu0 %vm449_vm0, %v448_v1  ;;  %s377_s13 = sshll.u32 %s510_s9, 1  ;;  %s378_s14 = sshll.u32 %s510_s9, 2  ;;  %vm211_vm7 = vcmask 130048  }
   0xe   : > { %v191_v2 = vshrl.u32 %v190_v0, 7  ;;  %s175_s17 = scalar_lea.vmem %s502_s0, %s377_s13  ;;  %s179_s20 = scalar_lea.vmem %s503_s1, %s378_s14 }
   0xf   : > { %v187_v6 = vld [vmem:[%s175_s17] sm:$0x3]  ;;  %s186_s23 = scalar_lea.vmem %s504_s2, %s378_s14 }
  0x10   : > { %v195_v3 = vsub.s32 0, %v191_v2  ;;  %v201_v4 = vsub.s32 1, %v191_v2  ;;  %v192_v5 = vadd.s32 8, %v191_v2  ;;  %v188_v9 = vld [vmem:[%s179_s20] sm:$0x7] }
  0x11   : > { %v189_v10 = vmul.f32 0.5, %v188_v9 }
  0x12   : > { %v196_v7 = vrot.slane %v187_v6, %v195_v3  ;;  %v202_v8 = vrot.slane %v187_v6, %v201_v4 }
  0x14   : > { %vm198_vm1 = vcmp.eq.s32.totalorder %v192_v5, %v196_v7  ;;  %vm204_vm2 = vcmp.eq.s32.totalorder %v192_v5, %v202_v8  ;;  %vm197_vm3 = vcmp.eq.s32.totalorder %v191_v2, %v196_v7  ;;  %vm203_vm4 = vcmp.eq.s32.totalorder %v191_v2, %v202_v8 }
  0x15   : > { %vm206_vm5 = vmor %vm198_vm1, %vm204_vm2 }
  0x16   : > { %391 = vmatpush3.msk.msra.mxu0 %vm206_vm5, %v450_v11  ;;  %vm205_vm6 = vmor %vm197_vm3, %vm203_vm4 }
  0x17   : > { %392 = vmatprep.subr.mxu0 %v448_v1 }
  0x18   : > { %393 = vmatpush3.msk.msra.mxu0 %vm205_vm6, %v450_v11 }
  0x19   : > { %395 = vmatmul.mubr.msk.f32.vlgmr.msra.gmra.mxu0 %vm211_vm7, %v189_v10 }
  0xd9   : > { %v281_v12 = vpop.f32.mrf.mxu0 }
  0xda   : > { %285 = vst [vmem:[%s186_s23] sm:$0x7] %v281_v12 }
  0xdb   : > { %v396_v13 = vpop.f32.mrf.mxu0 }
  0xdc PF: > { %s12_s11 = sadd.s32 1, %s446_s11   ;;  %s505_s9 = smov %s442_s10 }
  0xdd   : > { %p9_p5 = scmp.ge.s32.totalorder %s12_s11, 4   ;;  %s506_s10 = smov %s508_s12 }
  0xdf   :  { %11 = sbr.rel (!%p9_p5) target bundleno = 2 (0x2), region = 61 }

</bundles_post_ra>
